<compile_context>
chip_gen: v5e
topology: v5e:2x2
jax: 0.10.0
libtpu: 0.0.40
codegen_flags: <defaults>
</compile_context>

<pallas_src>
import jax
import jax.numpy as jnp
from jax.experimental import pallas as pl
from jax.experimental.pallas import tpu as pltpu

# --- model hyper-parameters (small, synthetic) -------------------------------
SEQ = 8          # n_in tokens in the decode step
D_MODEL = 32     # hidden size
N_HEADS = 4
HEAD_DIM = D_MODEL // N_HEADS
D_FF = 64
VOCAB = 128
NEG_INF = -1e9


def decoder_kernel(ids_ref, pos_ref, gtab_ref,               # VMEM ids/pos + table
                   wqkv_ref, wo_ref, w1_ref, w2_ref, wlm_ref,  # VMEM bf16 weights
                   logits_ref, hidden_ref, next_ref):        # outputs
    """Fused single-layer causal decoder: gather + attention + MLP + LM head."""
    # ---- fused embedding + positional gather as ONE one-hot MXU matmul ------
    # gtab = [emb ; pos_emb]  ->  each one-hot row has two hot lanes:
    # column ids[i] (token) and column VOCAB + pos[i] (position), so
    # hot @ gtab == emb[ids] + pos_emb[pos] in a single [S, V+S] x [V+S, D] dot.
    lane = jax.lax.broadcasted_iota(jnp.int32, (SEQ, VOCAB + SEQ), 1)
    hot = jnp.logical_or(lane == ids_ref[...],
                         lane == (VOCAB + pos_ref[...])).astype(jnp.float32)
    x = jnp.dot(hot, gtab_ref[...],
                preferred_element_type=jnp.float32)          # [S, D] f32

    # ---- causal additive mask built in-kernel (prefill, n_past = 0) ---------
    # TODO(synk): general attention_mask / KV-cache (n_past > 0) decode path.
    row = jax.lax.broadcasted_iota(jnp.int32, (SEQ, SEQ), 0)
    col = jax.lax.broadcasted_iota(jnp.int32, (SEQ, SEQ), 1)
    mask = jnp.where(col <= row, jnp.float32(0.0), jnp.float32(NEG_INF))

    # ---- QKV projection: one head-batched bf16 matmul, fp32 accumulation ----
    xb = jnp.broadcast_to(x.astype(jnp.bfloat16), (N_HEADS, SEQ, D_MODEL))
    qkvh = jnp.einsum("hsd,hde->hse", xb, wqkv_ref[...],
                      preferred_element_type=jnp.float32)    # [H, S, 3*Dh]
    q3 = qkvh[:, :, :HEAD_DIM]
    k3 = qkvh[:, :, HEAD_DIM:2 * HEAD_DIM]
    v3 = qkvh[:, :, 2 * HEAD_DIM:]

    # ---- batched multi-head causal attention (no per-head loop / concat) ----
    scale = 1.0 / (HEAD_DIM ** 0.5)
    s = jnp.einsum("hqd,hkd->hqk", q3, k3,
                   preferred_element_type=jnp.float32) * scale + mask[None]
    m = jnp.max(s, axis=-1, keepdims=True)
    p = jnp.exp(s - m)
    p = p * pl.reciprocal(jnp.sum(p, axis=-1, keepdims=True), approx=True)
    o3 = jnp.einsum("hqk,hkd->hqd", p, v3,
                    preferred_element_type=jnp.float32)      # [H, S, Dh]

    # output projection: head-batched matmul, then sum over heads
    proj = jnp.einsum("hsd,hde->hse", o3.astype(jnp.bfloat16), wo_ref[...],
                      preferred_element_type=jnp.float32)    # [H, S, D]
    h1 = x + jnp.sum(proj, axis=0)

    # ---- RMSNorm + gelu MLP (fp32 elementwise, bf16 MXU operands) -----------
    h1n = h1 * jax.lax.rsqrt(jnp.mean(h1 * h1, axis=-1, keepdims=True) + 1e-6)
    ff = jnp.dot(h1n.astype(jnp.bfloat16), w1_ref[...],
                 preferred_element_type=jnp.float32)
    ff = jax.nn.gelu(ff)
    h2 = h1 + jnp.dot(ff.astype(jnp.bfloat16), w2_ref[...],
                      preferred_element_type=jnp.float32)

    # ---- outputs -------------------------------------------------------------
    # hidden [8, 32] is a small masked store; logits [8, 128] is lane-dense.
    hidden_ref[...] = h2
    logits = jnp.dot(h2.astype(jnp.bfloat16), wlm_ref[...],
                     preferred_element_type=jnp.float32)     # [S, V]
    logits_ref[...] = logits

    # fused greedy `obtain_output`: first-max index of the last logits row
    last = logits[SEQ - 1:SEQ, :]                            # [1, V]
    row_max = jnp.max(last, axis=-1, keepdims=True)
    cidx = jax.lax.broadcasted_iota(jnp.int32, (1, VOCAB), 1).astype(jnp.float32)
    cand = jnp.where(last >= row_max, cidx, jnp.float32(VOCAB))
    next_ref[0] = jnp.min(cand).astype(jnp.int32)


_SMEM = pl.BlockSpec(memory_space=pltpu.MemorySpace.SMEM)
_VMEM = pl.BlockSpec(memory_space=pltpu.MemorySpace.VMEM)


@jax.jit
def model_forward(input_ids, attention_mask, position_ids, params):
    """Equivalent of `Base.forward(input_ids, attention_mask, position_ids, ...)`.

    input_ids      : [1, S] int32
    attention_mask : [1, 1, S, S] (prefill causal mask; rebuilt in-kernel)
    position_ids   : [1, S] int32
    returns        : (logits [1, S, V], hidden [1, S, D], next_token [1] int32)
    """
    del attention_mask  # causal prefill mask (n_past=0) is generated in-kernel
    ids = input_ids.astype(jnp.int32).reshape(SEQ, 1)   # batch must be 1
    pos = position_ids.astype(jnp.int32).reshape(SEQ, 1)

    logits, hidden, next_tok = pl.pallas_call(
        decoder_kernel,
        out_shape=(
            jax.ShapeDtypeStruct((SEQ, VOCAB), jnp.float32),
            jax.ShapeDtypeStruct((SEQ, D_MODEL), jnp.float32),
            jax.ShapeDtypeStruct((1,), jnp.int32),
        ),
        in_specs=[
            _VMEM, _VMEM,                        # token ids, position ids
            _VMEM,                               # packed gather table [V+S, D]
            _VMEM, _VMEM, _VMEM, _VMEM, _VMEM,   # wqkv_h, wo_h, w1, w2, wlm
        ],
        out_specs=(_VMEM, _VMEM, _SMEM),
    )(ids, pos, params["gtab"],
      params["wqkv_h"], params["wo_h"], params["w1"], params["w2"], params["wlm"])

    # TODO(synk): keep weights resident across decode steps (cross-call future /
    # decode loop folded into one pallas_call) and add a parallel grid axis for
    # the second v7x TensorCore once the toy dims are scaled up.
    return logits[None], hidden[None], next_tok    # re-add batch dim of 1


def reference_forward(input_ids, attention_mask, position_ids, params):
    """Pure-JAX reference mirroring the kernel math (for correctness check)."""
    ids, pos = input_ids[0], position_ids[0]
    x = params["emb"][ids] + params["pos_emb"][pos]              # [S, D] f32
    mask = jnp.where(attention_mask[0, 0] > 0, 0.0, NEG_INF).astype(jnp.float32)

    xb = x.astype(jnp.bfloat16)
    qkvh = jnp.einsum("sd,hde->hse", xb, params["wqkv_h"],
                      preferred_element_type=jnp.float32)        # [H, S, 3*Dh]
    q3 = qkvh[..., :HEAD_DIM]
    k3 = qkvh[..., HEAD_DIM:2 * HEAD_DIM]
    v3 = qkvh[..., 2 * HEAD_DIM:]

    scale = 1.0 / (HEAD_DIM ** 0.5)
    s = jnp.einsum("hqd,hkd->hqk", q3, k3,
                   preferred_element_type=jnp.float32) * scale + mask[None]
    p = jax.nn.softmax(s, axis=-1)
    o3 = jnp.einsum("hqk,hkd->hqd", p, v3, preferred_element_type=jnp.float32)

    proj = jnp.einsum("hsd,hde->hse", o3.astype(jnp.bfloat16), params["wo_h"],
                      preferred_element_type=jnp.float32)
    h1 = x + jnp.sum(proj, axis=0)

    h1n = h1 * jax.lax.rsqrt(jnp.mean(h1 * h1, axis=-1, keepdims=True) + 1e-6)
    ff = jax.nn.gelu(jnp.dot(h1n.astype(jnp.bfloat16), params["w1"],
                             preferred_element_type=jnp.float32))
    h2 = h1 + jnp.dot(ff.astype(jnp.bfloat16), params["w2"],
                      preferred_element_type=jnp.float32)
    logits = jnp.dot(h2.astype(jnp.bfloat16), params["wlm"],
                     preferred_element_type=jnp.float32)
    return logits[None], h2[None]


def init_params(key):
    ks = jax.random.split(key, 9)
    g = lambda k, shape, s: jax.random.normal(k, shape, jnp.float32) * s
    wq = g(ks[2], (D_MODEL, D_MODEL), D_MODEL ** -0.5)
    wk = g(ks[3], (D_MODEL, D_MODEL), D_MODEL ** -0.5)
    wv = g(ks[4], (D_MODEL, D_MODEL), D_MODEL ** -0.5)
    wo = g(ks[5], (D_MODEL, D_MODEL), D_MODEL ** -0.5)

    # host-side head-major packing: wq|wk|wv -> [H, D, 3*Dh], wo -> [H, Dh, D]
    to_heads = lambda w: w.reshape(D_MODEL, N_HEADS, HEAD_DIM).transpose(1, 0, 2)
    wqkv_h = jnp.concatenate([to_heads(wq), to_heads(wk), to_heads(wv)],
                             axis=-1).astype(jnp.bfloat16)       # [H, D, 3*Dh]
    wo_h = wo.reshape(N_HEADS, HEAD_DIM, D_MODEL).astype(jnp.bfloat16)

    emb = g(ks[0], (VOCAB, D_MODEL), 0.02)
    pos_emb = g(ks[1], (SEQ, D_MODEL), 0.02)

    return {
        "emb":     emb,
        "pos_emb": pos_emb,
        # host-side packed gather table for the in-kernel one-hot MXU gather
        "gtab":    jnp.concatenate([emb, pos_emb], axis=0),     # [V+S, D] f32
        "wqkv_h":  wqkv_h,
        "wo_h":    wo_h,
        "w1":      g(ks[6], (D_MODEL, D_FF), D_MODEL ** -0.5).astype(jnp.bfloat16),
        "w2":      g(ks[7], (D_FF, D_MODEL), D_FF ** -0.5).astype(jnp.bfloat16),
        "wlm":     g(ks[8], (D_MODEL, VOCAB), D_MODEL ** -0.5).astype(jnp.bfloat16),
    }


if __name__ == "__main__":
    key = jax.random.PRNGKey(0)
    params = init_params(key)

    # deterministic decode-step inputs (what Base.get_input would produce,
    # prefill case: n_past = 0, n_in = SEQ)
    input_ids = jax.random.randint(jax.random.fold_in(key, 1), (1, SEQ), 0, VOCAB,
                                   dtype=jnp.int32)
    position_ids = jnp.arange(SEQ, dtype=jnp.int32)[None]
    causal = jnp.tril(jnp.ones((SEQ, SEQ), jnp.float32))
    attention_mask = causal[None, None]                          # [1, 1, S, S]

    logits, hidden, next_tok = model_forward(input_ids, attention_mask,
                                             position_ids, params)
    jax.block_until_ready((logits, hidden, next_tok))

    ref_logits, ref_hidden = reference_forward(input_ids, attention_mask,
                                               position_ids, params)
    assert logits.shape == (1, SEQ, VOCAB) and hidden.shape == (1, SEQ, D_MODEL)
    assert jnp.allclose(logits, ref_logits, atol=2e-2, rtol=2e-2)
    assert jnp.allclose(hidden, ref_hidden, atol=2e-2, rtol=2e-2)
    # fused greedy `obtain_output` must match argmax of the kernel's own logits
    assert int(next_tok[0]) == int(jnp.argmax(logits[0, -1]))

    # TODO(synk): generate()'s Python-level loop / DynamicCache / Stat / EOS
    # bookkeeping is host-side control flow, not kernel compute; only the
    # model forward hot path is implemented in Pallas.
    print("KERNEL_OK")
</pallas_src>

<mosaic_0001>
module attributes {stable_mosaic.version = 11 : i64} {
  func.func @decoder_kernel(%arg0: memref<8x1xi32, #tpu.memory_space<vmem>>, %arg1: memref<8x1xi32, #tpu.memory_space<vmem>>, %arg2: memref<136x32xf32, #tpu.memory_space<vmem>>, %arg3: memref<4x32x24xbf16, #tpu.memory_space<vmem>>, %arg4: memref<4x8x32xbf16, #tpu.memory_space<vmem>>, %arg5: memref<32x64xbf16, #tpu.memory_space<vmem>>, %arg6: memref<64x32xbf16, #tpu.memory_space<vmem>>, %arg7: memref<32x128xbf16, #tpu.memory_space<vmem>>, %arg8: memref<8x128xf32, #tpu.memory_space<vmem>>, %arg9: memref<8x32xf32, #tpu.memory_space<vmem>>, %arg10: memref<1xi32, #tpu.memory_space<smem>>) attributes {dimension_semantics = [], scalar_prefetch = 0 : i64, scratch_operands = 0 : i64, tpu.core_type = #tpu.core_type<tc>} {
    %0 = tpu.iota {dimensions = array<i32: 1>} : vector<8x136xi32>
    %c0 = arith.constant 0 : index
    %c0_0 = arith.constant 0 : index
    %1 = vector.load %arg0[%c0, %c0_0] : memref<8x1xi32, #tpu.memory_space<vmem>>, vector<8x1xi32>
    %2 = vector.broadcast %1 : vector<8x1xi32> to vector<8x136xi32>
    %3 = arith.cmpi eq, %0, %2 : vector<8x136xi32>
    %c0_1 = arith.constant 0 : index
    %c0_2 = arith.constant 0 : index
    %4 = vector.load %arg1[%c0_1, %c0_2] : memref<8x1xi32, #tpu.memory_space<vmem>>, vector<8x1xi32>
    %c128_i32 = arith.constant 128 : i32
    %5 = vector.broadcast %c128_i32 : i32 to vector<8x1xi32>
    %6 = arith.addi %5, %4 : vector<8x1xi32>
    %7 = vector.broadcast %6 : vector<8x1xi32> to vector<8x136xi32>
    %8 = arith.cmpi eq, %0, %7 : vector<8x136xi32>
    %9 = arith.ori %3, %8 : vector<8x136xi1>
    %10 = arith.extui %9 : vector<8x136xi1> to vector<8x136xi32>
    %11 = arith.sitofp %10 : vector<8x136xi32> to vector<8x136xf32>
    %c0_3 = arith.constant 0 : index
    %c0_4 = arith.constant 0 : index
    %12 = vector.load %arg2[%c0_3, %c0_4] : memref<136x32xf32, #tpu.memory_space<vmem>>, vector<136x32xf32>
    %cst = arith.constant dense<0.000000e+00> : vector<8x32xf32>
    %13 = tpu.matmul %11, %12, %cst {dimension_numbers = #tpu.dot_dimension_numbers<[1], [0], [0], [1], [0, 0, 1, 1], [], []>} : vector<8x136xf32>, vector<136x32xf32>, vector<8x32xf32> -> vector<8x32xf32>
    %14 = tpu.iota {dimensions = array<i32: 0>} : vector<8x8xi32>
    %15 = tpu.iota {dimensions = array<i32: 1>} : vector<8x8xi32>
    %16 = arith.cmpi sle, %15, %14 : vector<8x8xi32>
    %cst_5 = arith.constant 0.000000e+00 : f32
    %cst_6 = arith.constant -1.000000e+09 : f32
    %17 = vector.broadcast %cst_5 : f32 to vector<8x8xf32>
    %18 = vector.broadcast %cst_6 : f32 to vector<8x8xf32>
    %19 = arith.select %16, %17, %18 : vector<8x8xi1>, vector<8x8xf32>
    %20 = arith.truncf %13 : vector<8x32xf32> to vector<8x32xbf16>
    %21 = vector.shape_cast %20 : vector<8x32xbf16> to vector<1x8x32xbf16>
    %22 = vector.broadcast %21 : vector<1x8x32xbf16> to vector<4x8x32xbf16>
    %c0_7 = arith.constant 0 : index
    %c0_8 = arith.constant 0 : index
    %c0_9 = arith.constant 0 : index
    %23 = vector.load %arg3[%c0_7, %c0_8, %c0_9] : memref<4x32x24xbf16, #tpu.memory_space<vmem>>, vector<4x32x24xbf16>
    "tpu.trace_start"() <{level = 10 : i32, message = "hsd,hde->hse"}> : () -> ()
    %cst_10 = arith.constant dense<0.000000e+00> : vector<4x8x24xf32>
    %24 = tpu.matmul %22, %23, %cst_10 {dimension_numbers = #tpu.dot_dimension_numbers<[2], [1], [1], [2], [0, 0, 0, 1, 1, 2], [0], [0]>} : vector<4x8x32xbf16>, vector<4x32x24xbf16>, vector<4x8x24xf32> -> vector<4x8x24xf32>
    "tpu.trace_stop"() : () -> ()
    %25 = vector.extract_strided_slice %24 {offsets = [0, 0, 0], sizes = [4, 8, 8], strides = [1, 1, 1]} : vector<4x8x24xf32> to vector<4x8x8xf32>
    %26 = vector.extract_strided_slice %24 {offsets = [0, 0, 8], sizes = [4, 8, 8], strides = [1, 1, 1]} : vector<4x8x24xf32> to vector<4x8x8xf32>
    %27 = vector.extract_strided_slice %24 {offsets = [0, 0, 16], sizes = [4, 8, 8], strides = [1, 1, 1]} : vector<4x8x24xf32> to vector<4x8x8xf32>
    "tpu.trace_start"() <{level = 10 : i32, message = "hqd,hkd->hqk"}> : () -> ()
    %cst_11 = arith.constant dense<0.000000e+00> : vector<4x8x8xf32>
    %28 = tpu.matmul %25, %26, %cst_11 {dimension_numbers = #tpu.dot_dimension_numbers<[2], [2], [1], [1], [0, 0, 0, 1, 1, 1], [0], [0]>} : vector<4x8x8xf32>, vector<4x8x8xf32>, vector<4x8x8xf32> -> vector<4x8x8xf32>
    "tpu.trace_stop"() : () -> ()
    %cst_12 = arith.constant 0.353553385 : f32
    %29 = vector.broadcast %cst_12 : f32 to vector<4x8x8xf32>
    %30 = arith.mulf %28, %29 : vector<4x8x8xf32>
    %31 = vector.shape_cast %19 : vector<8x8xf32> to vector<1x8x8xf32>
    %32 = vector.broadcast %31 : vector<1x8x8xf32> to vector<4x8x8xf32>
    %33 = arith.addf %30, %32 : vector<4x8x8xf32>
    %cst_13 = arith.constant dense<0xFF800000> : vector<4x8xf32>
    %34 = vector.multi_reduction <maximumf>, %33, %cst_13 [2] : vector<4x8x8xf32> to vector<4x8xf32>
    %35 = vector.shape_cast %34 : vector<4x8xf32> to vector<4x8x1xf32>
    %36 = vector.broadcast %35 : vector<4x8x1xf32> to vector<4x8x8xf32>
    %37 = arith.subf %33, %36 : vector<4x8x8xf32>
    %38 = math.exp %37 : vector<4x8x8xf32>
    %cst_14 = arith.constant dense<0.000000e+00> : vector<4x8xf32>
    %39 = vector.multi_reduction <add>, %38, %cst_14 [2] : vector<4x8x8xf32> to vector<4x8xf32>
    %40 = vector.shape_cast %39 : vector<4x8xf32> to vector<4x8x1xf32>
    %41 = tpu.reciprocal %40 {approx = true} : vector<4x8x1xf32> -> vector<4x8x1xf32>
    %42 = vector.broadcast %41 : vector<4x8x1xf32> to vector<4x8x8xf32>
    %43 = arith.mulf %38, %42 : vector<4x8x8xf32>
    "tpu.trace_start"() <{level = 10 : i32, message = "hqk,hkd->hqd"}> : () -> ()
    %cst_15 = arith.constant dense<0.000000e+00> : vector<4x8x8xf32>
    %44 = tpu.matmul %43, %27, %cst_15 {dimension_numbers = #tpu.dot_dimension_numbers<[2], [1], [1], [2], [0, 0, 0, 1, 1, 2], [0], [0]>} : vector<4x8x8xf32>, vector<4x8x8xf32>, vector<4x8x8xf32> -> vector<4x8x8xf32>
    "tpu.trace_stop"() : () -> ()
    %45 = arith.truncf %44 : vector<4x8x8xf32> to vector<4x8x8xbf16>
    %c0_16 = arith.constant 0 : index
    %c0_17 = arith.constant 0 : index
    %c0_18 = arith.constant 0 : index
    %46 = vector.load %arg4[%c0_16, %c0_17, %c0_18] : memref<4x8x32xbf16, #tpu.memory_space<vmem>>, vector<4x8x32xbf16>
    "tpu.trace_start"() <{level = 10 : i32, message = "hsd,hde->hse"}> : () -> ()
    %cst_19 = arith.constant dense<0.000000e+00> : vector<4x8x32xf32>
    %47 = tpu.matmul %45, %46, %cst_19 {dimension_numbers = #tpu.dot_dimension_numbers<[2], [1], [1], [2], [0, 0, 0, 1, 1, 2], [0], [0]>} : vector<4x8x8xbf16>, vector<4x8x32xbf16>, vector<4x8x32xf32> -> vector<4x8x32xf32>
    "tpu.trace_stop"() : () -> ()
    %cst_20 = arith.constant dense<0.000000e+00> : vector<8x32xf32>
    %48 = vector.multi_reduction <add>, %47, %cst_20 [0] : vector<4x8x32xf32> to vector<8x32xf32>
    %49 = arith.addf %13, %48 : vector<8x32xf32>
    %50 = arith.mulf %49, %49 : vector<8x32xf32>
    %cst_21 = arith.constant dense<0.000000e+00> : vector<8xf32>
    %51 = vector.multi_reduction <add>, %50, %cst_21 [1] : vector<8x32xf32> to vector<8xf32>
    %52 = vector.shape_cast %51 : vector<8xf32> to vector<8x1xf32>
    %cst_22 = arith.constant 3.200000e+01 : f32
    %53 = vector.broadcast %cst_22 : f32 to vector<8x1xf32>
    %54 = arith.divf %52, %53 : vector<8x1xf32>
    %cst_23 = arith.constant 9.99999997E-7 : f32
    %55 = vector.broadcast %cst_23 : f32 to vector<8x1xf32>
    %56 = arith.addf %54, %55 : vector<8x1xf32>
    %57 = math.rsqrt %56 : vector<8x1xf32>
    %58 = vector.broadcast %57 : vector<8x1xf32> to vector<8x32xf32>
    %59 = arith.mulf %49, %58 : vector<8x32xf32>
    %60 = arith.truncf %59 : vector<8x32xf32> to vector<8x32xbf16>
    %c0_24 = arith.constant 0 : index
    %c0_25 = arith.constant 0 : index
    %61 = vector.load %arg5[%c0_24, %c0_25] : memref<32x64xbf16, #tpu.memory_space<vmem>>, vector<32x64xbf16>
    %cst_26 = arith.constant dense<0.000000e+00> : vector<8x64xf32>
    %62 = tpu.matmul %60, %61, %cst_26 {dimension_numbers = #tpu.dot_dimension_numbers<[1], [0], [0], [1], [0, 0, 1, 1], [], []>} : vector<8x32xbf16>, vector<32x64xbf16>, vector<8x64xf32> -> vector<8x64xf32>
    %63 = arith.mulf %62, %62 : vector<8x64xf32>
    %64 = arith.mulf %62, %63 : vector<8x64xf32>
    %cst_27 = arith.constant 4.471500e-02 : f32
    %65 = vector.broadcast %cst_27 : f32 to vector<8x64xf32>
    %66 = arith.mulf %65, %64 : vector<8x64xf32>
    %67 = arith.addf %62, %66 : vector<8x64xf32>
    %cst_28 = arith.constant 0.797884583 : f32
    %68 = vector.broadcast %cst_28 : f32 to vector<8x64xf32>
    %69 = arith.mulf %68, %67 : vector<8x64xf32>
    %70 = math.tanh %69 : vector<8x64xf32>
    %cst_29 = arith.constant 1.000000e+00 : f32
    %71 = vector.broadcast %cst_29 : f32 to vector<8x64xf32>
    %72 = arith.addf %71, %70 : vector<8x64xf32>
    %cst_30 = arith.constant 5.000000e-01 : f32
    %73 = vector.broadcast %cst_30 : f32 to vector<8x64xf32>
    %74 = arith.mulf %73, %72 : vector<8x64xf32>
    %75 = arith.mulf %62, %74 : vector<8x64xf32>
    %76 = arith.truncf %75 : vector<8x64xf32> to vector<8x64xbf16>
    %c0_31 = arith.constant 0 : index
    %c0_32 = arith.constant 0 : index
    %77 = vector.load %arg6[%c0_31, %c0_32] : memref<64x32xbf16, #tpu.memory_space<vmem>>, vector<64x32xbf16>
    %cst_33 = arith.constant dense<0.000000e+00> : vector<8x32xf32>
    %78 = tpu.matmul %76, %77, %cst_33 {dimension_numbers = #tpu.dot_dimension_numbers<[1], [0], [0], [1], [0, 0, 1, 1], [], []>} : vector<8x64xbf16>, vector<64x32xbf16>, vector<8x32xf32> -> vector<8x32xf32>
    %79 = arith.addf %49, %78 : vector<8x32xf32>
    %c0_34 = arith.constant 0 : index
    %c0_35 = arith.constant 0 : index
    %80 = vector.load %arg9[%c0_34, %c0_35] : memref<8x32xf32, #tpu.memory_space<vmem>>, vector<8x32xf32>
    tpu.vector_store %arg9[%c0_34, %c0_35], %79 {strides = array<i32>} : memref<8x32xf32, #tpu.memory_space<vmem>>, vector<8x32xf32>,
    %81 = arith.truncf %79 : vector<8x32xf32> to vector<8x32xbf16>
    %c0_36 = arith.constant 0 : index
    %c0_37 = arith.constant 0 : index
    %82 = vector.load %arg7[%c0_36, %c0_37] : memref<32x128xbf16, #tpu.memory_space<vmem>>, vector<32x128xbf16>
    %cst_38 = arith.constant dense<0.000000e+00> : vector<8x128xf32>
    %83 = tpu.matmul %81, %82, %cst_38 {dimension_numbers = #tpu.dot_dimension_numbers<[1], [0], [0], [1], [0, 0, 1, 1], [], []>} : vector<8x32xbf16>, vector<32x128xbf16>, vector<8x128xf32> -> vector<8x128xf32>
    %c0_39 = arith.constant 0 : index
    %c0_40 = arith.constant 0 : index
    %84 = vector.load %arg8[%c0_39, %c0_40] : memref<8x128xf32, #tpu.memory_space<vmem>>, vector<8x128xf32>
    tpu.vector_store %arg8[%c0_39, %c0_40], %83 {strides = array<i32>} : memref<8x128xf32, #tpu.memory_space<vmem>>, vector<8x128xf32>,
    %85 = vector.extract_strided_slice %83 {offsets = [7, 0], sizes = [1, 128], strides = [1, 1]} : vector<8x128xf32> to vector<1x128xf32>
    %cst_41 = arith.constant dense<0xFF800000> : vector<1xf32>
    %86 = vector.multi_reduction <maximumf>, %85, %cst_41 [1] : vector<1x128xf32> to vector<1xf32>
    %87 = vector.shape_cast %86 : vector<1xf32> to vector<1x1xf32>
    %88 = tpu.iota {dimensions = array<i32: 1>} : vector<1x128xi32>
    %89 = arith.sitofp %88 : vector<1x128xi32> to vector<1x128xf32>
    %90 = vector.broadcast %87 : vector<1x1xf32> to vector<1x128xf32>
    %91 = arith.cmpf oge, %85, %90 : vector<1x128xf32>
    %cst_42 = arith.constant 1.280000e+02 : f32
    %92 = vector.broadcast %cst_42 : f32 to vector<1x128xf32>
    %93 = arith.select %91, %89, %92 : vector<1x128xi1>, vector<1x128xf32>
    %94 = vector.shape_cast %93 : vector<1x128xf32> to vector<1x1x128xf32>
    %cst_43 = arith.constant dense<0x7F800000> : vector<1xf32>
    %95 = vector.multi_reduction <minimumf>, %94, %cst_43 [1, 2] : vector<1x1x128xf32> to vector<1xf32>
    %96 = vector.shape_cast %95 : vector<1xf32> to vector<1x1x1xf32>
    %97 = vector.extract %96[0, 0, 0] : f32 from vector<1x1x1xf32>
    %98 = arith.fptosi %97 : f32 to i32
    %c0_44 = arith.constant 0 : index
    %99 = memref.load %arg10[%c0_44] : memref<1xi32, #tpu.memory_space<smem>>
    memref.store %98, %arg10[%c0_44] : memref<1xi32, #tpu.memory_space<smem>>
    return
  }
}

</mosaic_0001>

<bundles_post_ra>
// kernel: model_forward.1
= control target key start
LH: loop header
LB: loop body
LE: loop exit
PB: predicated region body
PF: predicated region fallthrough
CT: control target
= control target key end

     0   :  { %16 = vsyncpa [#allocation3], 0  ;;  %s1294_s0 = inlined_call_operand.vmem [shape: s32[8,1], index: 0, kind: input, shape index: {}]   ;;  %s1295_s1 = inlined_call_operand.vmem [shape: s32[8,1], index: 1, kind: input, shape index: {}]   ;;  %s1296_s2 = inlined_call_operand.vmem [shape: f32[136,32], index: 2, kind: input, shape index: {}]   ;;  %s1297_s3 = inlined_call_operand.vmem [shape: bf16[4,32,24], index: 3, kind: input, shape index: {}]   ;;  %s1298_s4 = inlined_call_operand.vmem [shape: bf16[4,8,32], index: 4, kind: input, shape index: {}]   ;;  %s1299_s5 = inlined_call_operand.vmem [shape: bf16[32,64], index: 5, kind: input, shape index: {}]   ;;  %s1300_s6 = inlined_call_operand.vmem [shape: bf16[64,32], index: 6, kind: input, shape index: {}]   ;;  %s1301_s7 = inlined_call_operand.vmem [shape: bf16[32,128], index: 7, kind: input, shape index: {}]   ;;  %s1302_s8 = inlined_call_operand.hbm [shape: f32[8,128], index: 8, kind: output, shape index: {0}]   ;;  %s1303_s9 = inlined_call_operand.hbm [shape: f32[8,32], index: 9, kind: output, shape index: {1}]   ;;  %s1304_s10 = inlined_call_operand.hbm [shape: s32[1], index: 10, kind: output, shape index: {2}]  }
   0x1   :  { %17 = vsyncpa [#allocation6], 0  ;;  %v39_v0 = vld [vmem:[%s1294_s0] sm:$0xff]  ;;  %v73_v1 = vld [vmem:[%s1296_s2 + $0x78] sm:$0xff]  ;;  %v1038_v2 = vmov 0  }
   0x2   :  { %944 = vset.pattern.permute.xlu0 %v1038_v2  ;;  %79 = vmatpush.msra.mxu0 %v73_v1  ;;  %v72_v3 = vld [vmem:[%s1296_s2 + $0x70] sm:$0xff]  ;;  %v71_v4 = vld [vmem:[%s1296_s2 + $0x68] sm:$0xff]  ;;  %v45_v5 = vld [vmem:[%s1295_s1] sm:$0xff] }
   0x3   :  { %41 = vperm.xlu0 %944, %v39_v0   ;;  %v70_v6 = vld [vmem:[%s1296_s2 + $0x60] sm:$0xff] }
   0x4   :  { %80 = vmatpush.msra.mxu0 %v72_v3 }
   0x5   :  { %18 = vsyncpa [#allocation4], 0  ;;  %v46_v7 = vadd.s32 128, %v45_v5  ;;  %v69_v8 = vld [vmem:[%s1296_s2 + $0x58] sm:$0xff]  ;;  %v68_v9 = vld [vmem:[%s1296_s2 + $0x50] sm:$0xff]  ;;  %v36_v24 = vlaneseq  ;;  %vm75_vm5 = vcmask 64512  }
   0x6   :  { %81 = vmatpush.msra.mxu0 %v71_v4  ;;  %v67_v10 = vld [vmem:[%s1296_s2 + $0x48] sm:$0xff]  ;;  %v66_v11 = vld [vmem:[%s1296_s2 + $0x40] sm:$0xff]  ;;  %v65_v12 = vld [vmem:[%s1296_s2 + $0x38] sm:$0xff]  ;;  %v1039_v29 = vmov 1.0   ;;  %v1040_v30 = vmov 0.0   ;;  %vm152_vm7 = vcmask 261120  }
   0x7   :  { %v64_v13 = vld [vmem:[%s1296_s2 + $0x30] sm:$0xff]  ;;  %v63_v14 = vld [vmem:[%s1296_s2 + $0x28] sm:$0xff]  ;;  %v62_v15 = vld [vmem:[%s1296_s2 + $0x20] sm:$0xff]  ;;  %v1169_v26 = vand.u32 127, %v36_v24  ;;  %v120_v53 = vshrl.u32 %v36_v24, 7  ;;  %s1043_s22 = smov 112  }
   0x8   :  { %82 = vmatpush.msra.mxu0 %v70_v6  ;;  %v61_v16 = vld [vmem:[%s1296_s2 + $0x18] sm:$0xff]  ;;  %v60_v17 = vld [vmem:[%s1296_s2 + $0x10] sm:$0xff]  ;;  %v59_v18 = vld [vmem:[%s1296_s2 + $0x8] sm:$0xff]  ;;  %v1042_v55 = vmov -1e+09   ;;  %vm519_vm9 = vcmask 1043456  }
   0x9   :  { %v58_v19 = vld [vmem:[%s1296_s2] sm:$0xff]  ;;  %v912_v21 = vld [vmem:[%s1297_s3 + $0x8] sm:$0xff]  ;;  %v914_v22 = vld [vmem:[%s1297_s3 + $0x18] sm:$0xff]  ;;  %v38_v27 = vadd.s32 128, %v1169_v26  ;;  %vm121_vm8 = vcmp.le.s32.totalorder %v1169_v26, %v120_v53  ;;  %vm700_vm14 = vcmask 523264   ;;  %vm753_vm15 = vcmask 1047559  }
   0xa   :  { %83 = vmatpush.msra.mxu0 %v69_v8  ;;  %v74_v20 = vld [vmem:[%s1296_s2 + $0x80] sm:$0xff]  ;;  %v916_v23 = vld [vmem:[%s1297_s3 + $0x28] sm:$0xff]  ;;  %162 = vmatpush.bf16.msra.mxu2 %v912_v21  ;;  %v913_v33 = vld [vmem:[%s1297_s3 + $0x10] sm:$0xff]  ;;  %v122_v56 = vsel %vm121_vm8, 0.0, %v1042_v55  ;;  %s1046_s23 = smov [#allocation5]   ;;  %s791_s27 = sshll.u32 %s1303_s9, 4  ;;  %s792_s27 = int_to_ptr.hbm [resolvable:$true] %s791_s27 }
   0xb   :  { %48 = vperm.xlu0 %944, %v46_v7   ;;  %114 = vmatpush.msra.mxu1 %v74_v20  ;;  %v911_v32 = vld [vmem:[%s1297_s3] sm:$0xff]  ;;  %v918_v35 = vld [vmem:[%s1297_s3 + $0x38] sm:$0xff]  ;;  %v917_v36 = vld [vmem:[%s1297_s3 + $0x30] sm:$0xff]  ;;  %s789_s24 = sshll.u32 %s1046_s23, 4  ;;  %s800_s30 = sshll.u32 %s1304_s10, 4  ;;  %s790_s24 = int_to_ptr.vmem [resolvable:$true] %s789_s24  ;;  %s801_s30 = int_to_ptr.hbm [resolvable:$true] %s800_s30 }
   0xc   :  { %84 = vmatpush.msra.mxu0 %v68_v9  ;;  %187 = vmatpush.bf16.msra.mxu3 %v914_v22  ;;  %v915_v34 = vld [vmem:[%s1297_s3 + $0x20] sm:$0xff]  ;;  %s1041_s3 = smov 120   ;;  %s1047_s11 = smov [#allocation7]  }
   0xd   :  { %212 = vmatpush.bf16.msrb.mxu1 %v916_v23 }
   0xe   :  { %85 = vmatpush.msra.mxu0 %v67_v10  ;;  %163 = vmatpush.bf16.msra.mxu2 %v911_v32 }
  0x10   :  { %86 = vmatpush.msra.mxu0 %v66_v11  ;;  %188 = vmatpush.bf16.msra.mxu3 %v913_v33 }
  0x11   :  { %213 = vmatpush.bf16.msrb.mxu1 %v915_v34 }
  0x12   :  { %87 = vmatpush.msra.mxu0 %v65_v12  ;;  %237 = vmatpush.bf16.msrb.mxu2 %v918_v35 }
  0x14   :  { %88 = vmatpush.msra.mxu0 %v64_v13 }
  0x16   :  { %89 = vmatpush.msra.mxu0 %v63_v14  ;;  %238 = vmatpush.bf16.msrb.mxu2 %v917_v36 }
  0x18   :  { %90 = vmatpush.msra.mxu0 %v62_v15 }
  0x1a   :  { %91 = vmatpush.msra.mxu0 %v61_v16 }
  0x1c   :  { %92 = vmatpush.msra.mxu0 %v60_v17 }
  0x1e   :  { %93 = vmatpush.msra.mxu0 %v59_v18 }
  0x20   :  { %94 = vmatpush.msra.mxu0 %v58_v19 }
  0x75   :  { %v42_v25 = vpop.permute.xlu0 %41 }
  0x76   :  { %vm43_vm0 = vcmp.eq.s32.totalorder %v1169_v26, %v42_v25  ;;  %vm44_vm3 = vcmp.eq.s32.totalorder %v38_v27, %v42_v25 }
  0x7d   :  { %v49_v28 = vpop.permute.xlu0 %48 }
  0x7e   :  { %vm50_vm1 = vcmp.eq.s32.totalorder %v1169_v26, %v49_v28  ;;  %vm51_vm2 = vcmp.eq.s32.totalorder %v38_v27, %v49_v28 }
  0x7f   :  { %vm52_vm4 = vmor %vm43_vm0, %vm50_vm1 }
  0x80   :  { %822 = vmatmul.msk.f32.vlgmr.msra.gmra.mxu0 %vm52_vm4, %v1039_v29  ;;  %vm53_vm6 = vmor %vm44_vm3, %vm51_vm2 }
  0x81   :  { %v821_v31 = vsel %vm53_vm6, 1.0, %v1040_v30 }
  0x82   :  { %823 = vmatmul.msk.f32.vlgmr.msra.gmra.mxu1 %vm75_vm5, %v821_v31 }
  0xfd   :  { %v96_v37 = vpop.f32.mrf.mxu0 }
  0xff   :  { %v116_v38 = vpop.f32.mrf.mxu1 }
 0x100   :  { %v1190_v39 = vadd.f32 %v116_v38, %v96_v37 }
 0x102   :  { %v123_v40 = vpack.c.bf16 %v1190_v39, %v1190_v39 }
 0x104   :  { %832 = vmatmul.msk.bf16.vlgmr.msra.gmra.mxu2 %vm152_vm7, %v123_v40  ;;  %841 = vmatmul.msk.bf16.vlgmr.msra.gmra.mxu3 %vm152_vm7, %v123_v40 }
 0x105   :  { %850 = vmatmul.msk.bf16.vlgmr.msrb.gmra.mxu1 %vm152_vm7, %v123_v40 }
 0x114   :  { %859 = vmatmul.msk.bf16.vlgmr.msrb.gmra.mxu2 %vm152_vm7, %v123_v40 }
 0x182   :  { %v215_v41 = vpop.f32.mrf.mxu1 }
 0x187   :  { %v1198_v42 = vpop.f32.mrf.mxu2  ;;  %v190_v43 = vpop.f32.mrf.mxu3 }
 0x188   :  { %272 = vrot.lane.b32.xlu2 %v190_v43, %s1041_s3  ;;  %245 = vrot.lane.b32.xlu1 %v1198_v42, %s1041_s3  ;;  %v945_v14 = vpack.i.bf16 %v215_v41, %v190_v43 }
 0x18a   :  { %v217_v44 = vpop.f32.mrf.mxu1 }
 0x18f   :  { %v167_v45 = vpop.f32.mrf.mxu2  ;;  %v192_v46 = vpop.f32.mrf.mxu3 }
 0x190   :  { %299 = vrot.lane.b32.xlu1 %v215_v41, %s1041_s3 }
 0x197   :  { %v1201_v47 = vpop.f32.mrf.mxu2 }
 0x198   :  { %326 = vrot.lane.b32.xlu2 %v1201_v47, %s1041_s3  ;;  %s780_s3 = sshll.u32 %s1302_s8, 4  ;;  %s781_s3 = int_to_ptr.hbm [resolvable:$true] %s780_s3 }
 0x19f   :  { %v242_v48 = vpop.f32.mrf.mxu2 }
 0x1a0   :  { %v513_v48 = vld [vmem:[%s1298_s4 + $0x4] sm:$0xf] }
 0x1e2   :  { %v273_v49 = vpop.permute.xlu2 %272 }
 0x1e3   :  { %862 = vmatpush.xpose.msk.msra.mxu1 %vm75_vm5, %v273_v49  ;;  %v540_v49 = vsel %vm519_vm9, %v513_v48, 0 }
 0x1e6   :  { %863 = vmatmul.msk.f32.vlgmr.msra.gmra.mxu1 %vm75_vm5, %v190_v43 }
 0x1f2   :  { %v327_v50 = vpop.permute.xlu2 %326 }
 0x1f3   :  { %866 = vmatpush.xpose.msk.msrb.mxu1 %vm75_vm5, %v327_v50  ;;  %v512_v50 = vld [vmem:[%s1298_s4] sm:$0xf] }
 0x1f6   :  { %867 = vmatmul.msk.f32.vlgmr.msrb.gmra.mxu1 %vm75_vm5, %v1201_v47 }
 0x1fa   :  { %v246_v51 = vpop.permute.xlu1 %245 }
 0x1fb   :  { %860 = vmatpush.xpose.msk.msrb.mxu3 %vm75_vm5, %v246_v51  ;;  %v521_v51 = vsel %vm519_vm9, %v512_v50, 0 }
 0x1fc   :  { %530 = vmatpush.bf16.msrb.mxu0 %v521_v51 }
 0x1fe   :  { %861 = vmatmul.msk.f32.vlgmr.msrb.gmra.mxu3 %vm75_vm5, %v1198_v42 }
 0x202   :  { %v300_v52 = vpop.permute.xlu1 %299 }
 0x203   :  { %864 = vmatpush.xpose.msk.msra.mxu3 %vm75_vm5, %v300_v52  ;;  %v514_v52 = vld [vmem:[%s1298_s4 + $0x8] sm:$0xf] }
 0x204   :  { %v559_v53 = vsel %vm519_vm9, %v514_v52, 0 }
 0x206   :  { %865 = vmatmul.msk.f32.vlgmr.msra.gmra.mxu3 %vm75_vm5, %v215_v41 }
 0x263   :  { %v295_v54 = vpop.f32.mrf.mxu1 }
 0x264   :  { %v353_v57 = vmul.f32 0.35355338, %v295_v54 }
 0x266   :  { %v357_v58 = vadd.f32 %v353_v57, %v122_v56 }
 0x268   :  { %v363_v59 = vsel %vm75_vm5, %v357_v58, -inf }
 0x269   :  { %364 = vmax.xlane.f32.xlu0 %v363_v59 }
 0x273   :  { %v349_v62 = vpop.f32.mrf.mxu1 }
 0x274   :  { %v355_v0 = vmul.f32 0.35355338, %v349_v62 }
 0x276   :  { %v359_v4 = vadd.f32 %v355_v0, %v122_v56 }
 0x278   :  { %v369_v7 = vsel %vm75_vm5, %v359_v4, -inf }
 0x281   :  { %v268_v60 = vpop.f32.mrf.mxu3 }
 0x282   :  { %v352_v61 = vmul.f32 0.35355338, %v268_v60 }
 0x284   :  { %v356_v63 = vadd.f32 %v352_v61, %v122_v56 }
 0x286   :  { %v360_v1 = vsel %vm75_vm5, %v356_v63, -inf }
 0x287   :  { %361 = vmax.xlane.f32.xlu2 %v360_v1 }
 0x289   :  { %v322_v2 = vpop.f32.mrf.mxu3 }
 0x28a   :  { %v354_v3 = vmul.f32 0.35355338, %v322_v2 }
 0x28c   :  { %v358_v5 = vadd.f32 %v354_v3, %v122_v56  ;;  %v515_v56 = vld [vmem:[%s1298_s4 + $0xc] sm:$0xf] }
 0x28e   :  { %v366_v6 = vsel %vm75_vm5, %v358_v5, -inf }
 0x28f   :  { %367 = vmax.xlane.f32.xlu1 %v366_v6  ;;  %370 = vmax.xlane.f32.xlu2 %v369_v7 }
 0x2dc   :  { %v365_v8 = vpop.xlane.xlu0 %364 }
 0x2dd   :  { %v373_v9 = vsub.f32 %v357_v58, %v365_v8  ;;  %v578_v58 = vsel %vm519_vm9, %v515_v56, 0 }
 0x2df   :  { %v378_v10 = vmul.f32 1.442695, %v373_v9 }
 0x2e1   :  { %950 = vpow2.f32 %v378_v10 }
 0x2e7   :  { %v951_v11 = vpop.eup %950 }
 0x2e8   :  { %v387_v12 = vsel %vm75_vm5, %v951_v11, 0.0 }
 0x2e9   :  { %388 = vadd.xlane.f32.xlu0 %v387_v12 }
 0x2fa   :  { %v362_v13 = vpop.xlane.xlu2 %361 }
 0x2fb   :  { %v372_v15 = vsub.f32 %v356_v63, %v362_v13 }
 0x2fd   :  { %v376_v16 = vmul.f32 1.442695, %v372_v15  ;;  %946 = vrot.lane.b32.xlu0 %v945_v14, %s1043_s22 }
 0x2ff   :  { %952 = vpow2.f32 %v376_v16 }
 0x302   :  { %v368_v17 = vpop.xlane.xlu1 %367  ;;  %v371_v18 = vpop.xlane.xlu2 %370 }
 0x303   :  { %v374_v19 = vsub.f32 %v358_v5, %v368_v17  ;;  %v375_v22 = vsub.f32 %v359_v4, %v371_v18  ;;  %v1044_v18 = vmov 32.0  }
 0x305   :  { %v953_v20 = vpop.eup %952  ;;  %v380_v21 = vmul.f32 1.442695, %v374_v19  ;;  %v382_v24 = vmul.f32 1.442695, %v375_v22  ;;  %v920_v22 = vld [vmem:[%s1299_s5 + $0x8] sm:$0xff] }
 0x306   :  { %v384_v23 = vsel %vm75_vm5, %v953_v20, 0.0  ;;  %651 = vmatpush.bf16.msra.mxu0 %v920_v22 }
 0x307   :  { %954 = vpow2.f32 %v380_v21  ;;  %385 = vadd.xlane.f32.xlu2 %v384_v23 }
 0x308   :  { %956 = vpow2.f32 %v382_v24 }
 0x30d   :  { %v955_v25 = vpop.eup %954 }
 0x30e   :  { %v390_v27 = vsel %vm75_vm5, %v955_v25, 0.0  ;;  %v957_v28 = vpop.eup %956 }
 0x30f   :  { %391 = vadd.xlane.f32.xlu1 %v390_v27  ;;  %v393_v29 = vsel %vm75_vm5, %v957_v28, 0.0 }
 0x317   :  { %394 = vadd.xlane.f32.xlu1 %v393_v29 }
 0x31f   :  { %404 = vrot.lane.b32.xlu2 %v1198_v42, %s1043_s22 }
 0x330   :  { %482 = vrot.lane.b32.xlu1 %v1201_v47, %s1043_s22  ;;  %s1045_s22 = smov [#allocation2]  }
 0x331   :  { %s778_s0 = sshll.u32 %s1045_s22, 4  ;;  %s779_s0 = int_to_ptr.vmem [resolvable:$true] %s778_s0 }
 0x35c   :  { %v389_v30 = vpop.xlane.xlu0 %388 }
 0x35d   :  { %958 = vrcp.f32 %v389_v30 }
 0x363   :  { %v959_v31 = vpop.eup %958 }
 0x364   :  { %v401_v35 = vmul.f32 %v959_v31, %v951_v11 }
 0x36f   :  { %v947_v32 = vpop.permute.xlu0 %946 }
 0x370   :  { %v949_v33 = vunpack.i.h.bf16 %v947_v32  ;;  %v948_v34 = vunpack.i.l.bf16 %v947_v32 }
 0x372   :  { %451 = vmatpush.msra.mxu2 %v948_v34  ;;  %477 = vmatpush.msrb.mxu3 %v949_v33 }
 0x373   :  { %869 = vmatmul.msk.f32.vlgmr.msra.gmra.mxu2 %vm75_vm5, %v401_v35 }
 0x374   :  { %549 = vmatpush.bf16.msrb.mxu2 %v540_v49  ;;  %568 = vmatpush.bf16.msra.mxu3 %v559_v53 }
 0x37a   :  { %v386_v36 = vpop.xlane.xlu2 %385 }
 0x37b   :  { %960 = vrcp.f32 %v386_v36 }
 0x381   :  { %v961_v37 = vpop.eup %960 }
 0x382   :  { %v400_v38 = vmul.f32 %v961_v37, %v953_v20  ;;  %v392_v40 = vpop.xlane.xlu1 %391  ;;  %v405_v41 = vpop.permute.xlu2 %404 }
 0x383   :  { %962 = vrcp.f32 %v392_v40  ;;  %425 = vmatpush.msra.mxu1 %v405_v41  ;;  %v924_v40 = vld [vmem:[%s1300_s6 + $0x18] sm:$0xff]  ;;  %v923_v41 = vld [vmem:[%s1300_s6 + $0x10] sm:$0xff] }
 0x384   :  { %868 = vmatmul.msk.f32.vlgmr.msra.gmra.mxu1 %vm75_vm5, %v400_v38  ;;  %708 = vmatpush.bf16.msra.mxu2 %v924_v40 }
 0x388   :  { %709 = vmatpush.bf16.msra.mxu2 %v923_v41 }
 0x389   :  { %v963_v42 = vpop.eup %962 }
 0x38a   :  { %v402_v43 = vmul.f32 %v963_v42, %v955_v25  ;;  %v395_v44 = vpop.xlane.xlu1 %394  ;;  %v922_v42 = vld [vmem:[%s1300_s6 + $0x8] sm:$0xff] }
 0x38b   :  { %964 = vrcp.f32 %v395_v44  ;;  %v926_v44 = vld [vmem:[%s1301_s7 + $0x8] sm:$0xff] }
 0x38c   :  { %870 = vmatmul.msk.f32.vlgmr.msrb.gmra.mxu3 %vm75_vm5, %v402_v43  ;;  %966 = vrcp.f32 %v1044_v18  ;;  %710 = vmatpush.bf16.msra.mxu2 %v922_v42  ;;  %v921_v43 = vld [vmem:[%s1300_s6] sm:$0xff] }
 0x38d   :  { %745 = vmatpush.bf16.msrb.mxu3 %v926_v44 }
 0x390   :  { %711 = vmatpush.bf16.msra.mxu2 %v921_v43 }
 0x391   :  { %v965_v45 = vpop.eup %964 }
 0x392   :  { %v403_v46 = vmul.f32 %v965_v45, %v957_v28  ;;  %v967_v19 = vpop.eup %966 }
 0x393   :  { %v606_v20 = vmul.f32 32.0, %v967_v19  ;;  %vm610_vm10 = vweird.f32 %v967_v19 }
 0x395   :  { %v607_v21 = vsub.f32 1.0, %v606_v20 }
 0x397   :  { %v608_v23 = vmul.f32 %v967_v19, %v607_v21 }
 0x399   :  { %v609_v24 = vadd.f32 %v967_v19, %v608_v23 }
 0x39b   :  { %v611_v25 = vsel %vm610_vm10, %v967_v19, %v609_v24 }
 0x3a2   :  { %v483_v47 = vpop.permute.xlu1 %482 }
 0x3a3   :  { %503 = vmatpush.msrb.mxu1 %v483_v47 }
 0x3a4   :  { %871 = vmatmul.msk.f32.vlgmr.msrb.gmra.mxu1 %vm75_vm5, %v403_v46 }
 0x3a5   :  { %587 = vmatpush.bf16.msra.mxu1 %v578_v58 }
 0x3f6   :  { %v453_v54 = vpop.f32.mrf.mxu2 }
 0x3f7   :  { %v509_v55 = vpack.c.bf16 %v453_v54, %v453_v54 }
 0x3f9   :  { %873 = vmatmul.msk.bf16.vlgmr.msrb.gmra.mxu2 %vm75_vm5, %v509_v55 }
 0x401   :  { %v427_v57 = vpop.f32.mrf.mxu1 }
 0x402   :  { %v508_v59 = vpack.c.bf16 %v427_v57, %v427_v57  ;;  %v925_v57 = vld [vmem:[%s1301_s7] sm:$0xff] }
 0x403   :  { %746 = vmatpush.bf16.msrb.mxu3 %v925_v57 }
 0x404   :  { %872 = vmatmul.msk.bf16.vlgmr.msrb.gmra.mxu0 %vm75_vm5, %v508_v59 }
 0x40f   :  { %v479_v60 = vpop.f32.mrf.mxu3 }
 0x410   :  { %v510_v61 = vpack.c.bf16 %v479_v60, %v479_v60 }
 0x412   :  { %874 = vmatmul.msk.bf16.vlgmr.msra.gmra.mxu3 %vm75_vm5, %v510_v61 }
 0x421   :  { %v505_v62 = vpop.f32.mrf.mxu1 }
 0x422   :  { %v511_v63 = vpack.c.bf16 %v505_v62, %v505_v62 }
 0x424   :  { %875 = vmatmul.msk.bf16.vlgmr.msra.gmra.mxu1 %vm75_vm5, %v511_v63 }
 0x47c   :  { %v551_v0 = vpop.f32.mrf.mxu2 }
 0x47d   :  { %v594_v7 = vsel %vm152_vm7, %v551_v0, 0.0 }
 0x481   :  { %v532_v1 = vpop.f32.mrf.mxu0 }
 0x482   :  { %v593_v5 = vsel %vm152_vm7, %v532_v1, 0.0  ;;  %v757_v1 = vcvt.s32.f32 %v1169_v26 }
 0x483   :  { %v595_v9 = vadd.f32 %v594_v7, %v593_v5 }
 0x484   :  { %v553_v2 = vpop.f32.mrf.mxu2 }
 0x489   :  { %v534_v3 = vpop.f32.mrf.mxu0 }
 0x495   :  { %v570_v4 = vpop.f32.mrf.mxu3 }
 0x496   :  { %v596_v8 = vsel %vm152_vm7, %v570_v4, 0.0 }
 0x497   :  { %v597_v10 = vadd.f32 %v596_v8, %v595_v9 }
 0x49d   :  { %v572_v6 = vpop.f32.mrf.mxu3 }
 0x4a1   :  { %v589_v11 = vpop.f32.mrf.mxu1 }
 0x4a2   :  { %v598_v12 = vsel %vm152_vm7, %v589_v11, 0.0 }
 0x4a3   :  { %v599_v13 = vadd.f32 %v598_v12, %v597_v10 }
 0x4a5   :  { %v1250_v14 = vadd.f32 %v599_v13, %v1190_v39  ;;  %v919_v39 = vld [vmem:[%s1299_s5] sm:$0xff] }
 0x4a6   :  { %652 = vmatpush.bf16.msra.mxu0 %v919_v39 }
 0x4a7   :  { %v601_v15 = vmul.f32 %v1250_v14, %v1250_v14 }
 0x4a9   :  { %v591_v16 = vpop.f32.mrf.mxu1  ;;  %v602_v17 = vsel %vm152_vm7, %v601_v15, 0.0 }
 0x4aa   :  { %603 = vadd.xlane.f32.xlu0 %v602_v17 }
 0x51d   :  { %v604_v27 = vpop.xlane.xlu0 %603 }
 0x51e   :  { %v612_v28 = vmul.f32 %v611_v25, %v604_v27 }
 0x520   :  { %v613_v29 = vadd.f32 1e-06, %v612_v28 }
 0x522   :  { %968 = vrsqrt.f32 %v613_v29  ;;  %vm620_vm12 = vweird.f32 %v613_v29 }
 0x528   :  { %v969_v30 = vpop.eup %968 }
 0x529   :  { %v615_v31 = vmul.f32 %v969_v30, %v613_v29  ;;  %vm621_vm11 = vweird.f32 %v969_v30 }
 0x52a   :  { %vm622_vm13 = vmor %vm620_vm12, %vm621_vm11 }
 0x52b   :  { %v616_v32 = vmul.f32 %v969_v30, %v615_v31 }
 0x52d   :  { %v617_v33 = vmul.f32 0.5, %v616_v32 }
 0x52f   :  { %v618_v34 = vsub.f32 1.5, %v617_v33 }
 0x531   :  { %v619_v35 = vmul.f32 %v969_v30, %v618_v34 }
 0x533   :  { %v623_v36 = vsel %vm622_vm13, %v969_v30, %v619_v35 }
 0x534   :  { %v624_v37 = vmul.f32 %v623_v36, %v1250_v14 }
 0x536   :  { %v625_v38 = vpack.c.bf16 %v624_v37, %v624_v37 }
 0x538   :  { %884 = vmatmul.msk.bf16.vlgmr.msra.gmra.mxu0 %vm152_vm7, %v625_v38 }
 0x5b5   :  { %v654_v45 = vpop.f32.mrf.mxu0 }
 0x5b6   :  { %v658_v46 = vmul.f32 %v654_v45, %v654_v45 }
 0x5b8   :  { %v659_v47 = vmul.f32 %v658_v46, %v654_v45 }
 0x5ba   :  { %v660_v48 = vmul.f32 0.044715, %v659_v47 }
 0x5bc   :  { %v661_v49 = vadd.f32 %v660_v48, %v654_v45 }
 0x5bd   :  { %v656_v50 = vpop.f32.mrf.mxu0 }
 0x5be   :  { %v662_v51 = vmul.f32 0.7978846, %v661_v49 }
 0x5c0   :  { %970 = vtanh.f32 %v662_v51 }
 0x5c6   :  { %v971_v52 = vpop.eup %970 }
 0x5c7   :  { %v664_v53 = vadd.f32 1.0, %v971_v52 }
 0x5c9   :  { %v665_v54 = vmul.f32 0.5, %v664_v53 }
 0x5cb   :  { %v666_v55 = vmul.f32 %v665_v54, %v654_v45 }
 0x5cd   :  { %v667_v56 = vpack.c.bf16 %v666_v55, %v666_v55 }
 0x5cf   :  { %901 = vmatmul.msk.bf16.vlgmr.msra.gmra.mxu2 %vm700_vm14, %v667_v56 }
 0x652   :  { %v713_v58 = vpop.f32.mrf.mxu2 }
 0x653   :  { %v717_v59 = vadd.f32 %v713_v58, %v1250_v14 }
 0x655   :  { %v719_v60 = vpack.c.bf16 %v717_v59, %v717_v59  ;;  %718 = vst.msk [vmem:[#allocation5] sm:$0xff] %vm152_vm7, %v717_v59 }
 0x656   :  { %794 = dma.vmem_to_hbm [thread:$0]  %s790_s24, 128, %s792_s27, [#allocation6]  }
 0x657   :  { %910 = vmatmul.msk.bf16.vlgmr.msrb.gmra.mxu3 %vm152_vm7, %v719_v60 }
 0x65a   :  { %v715_v61 = vpop.f32.mrf.mxu2 }
 0x6da   :  { %v748_v62 = vpop.f32.mrf.mxu3 }
 0x6db   :  { %752 = vst [vmem:[#allocation2] sm:$0xff] %v748_v62  ;;  %v754_v63 = vsel %vm753_vm15, %v748_v62, -inf }
 0x6dc   :  { %755 = vmax.xlane.f32.xlu2 %v754_v63  ;;  %783 = dma.vmem_to_hbm [thread:$0]  %s779_s0, 128, %s781_s3, [#allocation3]  }
 0x6e2   :  { %v750_v0 = vpop.f32.mrf.mxu3 }
 0x74f   :  { %v756_v2 = vpop.xlane.xlu2 %755 }
 0x750   :  { %vm758_vm0 = vcmp.ge.f32.partialorder %v748_v62, %v756_v2 }
 0x751   :  { %v759_v3 = vsel %vm758_vm0, %v757_v1, 128.0 }
 0x752   :  { %v760_v4 = vsel %vm753_vm15, %v759_v3, inf }
 0x753   :  { %761 = vmin.xlane.f32.xlu1 %v760_v4 }
 0x7c6   :  { %v762_v26 = vpop.xlane.xlu1 %761 }
 0x7c7   :  { %v763_v5 = vrot.slane %v762_v26, 4 }
 0x7c9   :  { %v764_v6 = vmin.f32 %v762_v26, %v763_v5 }
 0x7cb   :  { %v765_v7 = vrot.slane %v764_v6, 2 }
 0x7cd   :  { %v766_v8 = vmin.f32 %v764_v6, %v765_v7 }
 0x7cf   :  { %v767_v9 = vrot.slane %v766_v8, 1 }
 0x7d1   :  { %v768_v10 = vmin.f32 %v766_v8, %v767_v9 }
 0x7d3   :  { %927 = vpush %v768_v10 }
 0x804   :  { %s928_s8 = spop %927 }
 0x805   :  { %p929_p0 = scmp.lt.s32.totalorder %s928_s8, 0  ;;  %s930_s1 = sceil.f32 %s928_s8 }
 0x806   :  { %s931_s28 = sfloor.f32 %s928_s8 }
 0x807   :  { %s1306_s1 = smov (!%p929_p0, %s930_s1), %s931_s28 }
 0x808   :  { %s933_s9 = scvt.f32.s32 %s1306_s1 }
 0x80a   :  { %772 = sst [smem:[#allocation7]] %s933_s9 }
 0x80b   :  { %803 = dma.smem_to_hbm %s1047_s11, 16, %s801_s30, [#allocation4]  }
 0x80c   :  { %1032 = dma.done.wait [#allocation3], 128  }
 0x80d   :  { %1033 = vsyncadd [#allocation3], 4294967168 }
 0x80e   :  { %1034 = dma.done.wait [#allocation6], 128  }
 0x80f   :  { %1035 = vsyncadd [#allocation6], 4294967168 }
 0x810   :  { %1036 = dma.done.wait [#allocation4], 16  }
 0x811   :  { %1037 = vsyncadd [#allocation4], 4294967280 }
 0x812   :  { %816 = sfence }
 0x813   :  { %817 = vsyncpa [#allocation3], 1 }
 0x814   :  { %818 = vsyncpa [#allocation6], 1 }
 0x815   :  { %819 = vsyncpa [#allocation4], 1 }

</bundles_post_ra>
